<compile_context>
chip_gen: v6e
topology: v6e:2x2x1
jax: 0.10.0
libtpu: 0.0.40
codegen_flags: <defaults>
</compile_context>

<pallas_src>
import functools

import jax
import jax.numpy as jnp
from jax import lax
from jax.experimental import pallas as pl
from jax.experimental.pallas import tpu as pltpu


# ----------------------------- Pallas kernel ------------------------------

def _augment_kernel(top_ref, x_ref, mv_ref, mh_ref, o_ref):
    """Fused crop + vertical flip + horizontal flip for a block of Bt images.

    top_ref: (1,)            int32 crop-top offset (SMEM, scalar prefetch)
    x_ref:   (Bt, C, H, W)   input block (NCHW, native dtype)
    mv_ref:  (S, S)          row-flip 0/1 matrix (identity or anti-identity)
    mh_ref:  (W, S)          column crop+flip 0/1 selection matrix
    o_ref:   (Bt, C, S, S)   augmented output block (same dtype as input)
    """
    bt, c, _, w = x_ref.shape
    s = o_ref.shape[-1]
    g = bt * c
    top = top_ref[0]

    # Crop rows: dynamic sublane slice driven by the prefetched scalar
    # (no full-H contraction, no (S, H) operand).
    cropped = x_ref[:, :, pl.ds(top, s), :].reshape(g, s, w)        # (G, S, W)
    cropped = cropped.astype(mv_ref.dtype)

    # Vertical flip: tiny (S, S) one-hot matrix shared across the block,
    # applied as a batched matmul (batch dim = G = Bt*C).
    mv_b = jnp.broadcast_to(mv_ref[...], (g, s, s))
    rows = jnp.einsum("gij,gjw->giw", mv_b, cropped,
                      preferred_element_type=jnp.float32)           # (G, S, W)

    # Horizontal crop + flip: one shared (W, S) one-hot matmul with an
    # MXU-sized M dim (G*S rows per step).
    out = jnp.dot(rows.reshape(g * s, w).astype(mh_ref.dtype), mh_ref[...],
                  preferred_element_type=jnp.float32)               # (G*S, S)

    o_ref[...] = out.reshape(bt, c, s, s).astype(o_ref.dtype)


def _pick_batch_tile(batch, channels, cropsize):
    """Images per grid step: target ~256 matmul rows, but keep >= 2 grid steps
    when possible so both v7x TensorCores get work."""
    target_rows = 256
    bt = max(1, target_rows // max(1, channels * cropsize))
    bt = min(bt, batch)
    if batch >= 2:
        bt = min(bt, batch // 2)
    bt = max(1, bt)
    while batch % bt:
        bt -= 1
    return bt


# ------------------------------ Forward pass ------------------------------

def augmentation_forward(x, top, left, flip_h, flip_v, *, cropsize):
    """x: (B, C, H, W) NCHW. Returns augmented (B, C, cropsize, cropsize), same dtype.

    top/left: int32 scalars (crop offsets); flip_h/flip_v: bool scalars.
    """
    B, C, H, W = x.shape
    S = cropsize
    dtype = x.dtype
    mat_dtype = dtype if jnp.issubdtype(dtype, jnp.floating) else jnp.float32

    # Row-flip matrix (S, S): identity if not flip_v, anti-identity if flip_v.
    ri = jnp.arange(S, dtype=jnp.int32)
    src_r = jnp.where(flip_v, S - 1 - ri, ri)
    mv = (src_r[:, None] == ri[None, :]).astype(mat_dtype)                    # (S, S)

    # Column crop+flip matrix (W, S): output col j reads input col
    # left + (S-1-j if flip_h else j).
    cj = jnp.arange(S, dtype=jnp.int32)
    src_c = left + jnp.where(flip_h, S - 1 - cj, cj)
    mh = (jnp.arange(W, dtype=jnp.int32)[:, None] == src_c[None, :]).astype(mat_dtype)  # (W, S)

    top_smem = jnp.asarray(top, jnp.int32).reshape(1)

    bt = _pick_batch_tile(B, C, S)
    steps = B // bt

    itemsize = jnp.dtype(dtype).itemsize
    cost = pl.CostEstimate(
        flops=4 * B * C * S * S * W,                     # two one-hot matmuls
        transcendentals=0,
        bytes_accessed=(B * C * H * W * itemsize
                        + B * C * S * S * itemsize
                        + (mv.size + mh.size) * jnp.dtype(mat_dtype).itemsize),
    )

    return pl.pallas_call(
        _augment_kernel,
        out_shape=jax.ShapeDtypeStruct((B, C, S, S), dtype),
        grid_spec=pltpu.PrefetchScalarGridSpec(
            num_scalar_prefetch=1,
            grid=(steps,),
            in_specs=[
                pl.BlockSpec((bt, C, H, W), lambda b, top_ref: (b, 0, 0, 0)),
                pl.BlockSpec((S, S), lambda b, top_ref: (0, 0)),    # resident
                pl.BlockSpec((W, S), lambda b, top_ref: (0, 0)),    # resident
            ],
            out_specs=pl.BlockSpec((bt, C, S, S), lambda b, top_ref: (b, 0, 0, 0)),
        ),
        compiler_params=pltpu.CompilerParams(
            dimension_semantics=("parallel",)),
        cost_estimate=cost,
    )(top_smem, x, mv, mh)


# ------------------------------ Pure-JAX reference ------------------------------

def augmentation_reference(x, top, left, flip_h, flip_v, *, cropsize):
    B, C, H, W = x.shape
    S = cropsize
    cropped = lax.dynamic_slice(x, (0, 0, top, left), (B, C, S, S))
    h = jnp.where(flip_h, jnp.flip(cropped, axis=-1), cropped)
    v = jnp.where(flip_v, jnp.flip(h, axis=-2), h)
    return v


# ------------------------------ Main ------------------------------

if __name__ == "__main__":
    key = jax.random.PRNGKey(0)
    kx, kt, kl, kh, kv = jax.random.split(key, 5)

    # Small shapes: batch=2, channels=4, input 48x48, cropsize 32 (NCHW like torch).
    B, C, H, W = 2, 4, 48, 48
    CROPSIZE = 32

    x = jax.random.normal(kx, (B, C, H, W), jnp.float32)

    # Randomness drawn once per forward call (same params for the whole batch,
    # matching torchvision transforms applied to a batched tensor).
    top = jax.random.randint(kt, (), 0, H - CROPSIZE + 1, dtype=jnp.int32)
    left = jax.random.randint(kl, (), 0, W - CROPSIZE + 1, dtype=jnp.int32)
    flip_h = jax.random.bernoulli(kh)   # p = 0.5
    flip_v = jax.random.bernoulli(kv)   # p = 0.5

    fwd = jax.jit(functools.partial(augmentation_forward, cropsize=CROPSIZE))
    out = jax.block_until_ready(fwd(x, top, left, flip_h, flip_v))
    assert out.shape == (B, C, CROPSIZE, CROPSIZE), out.shape
    assert out.dtype == x.dtype, out.dtype

    ref_fn = jax.jit(functools.partial(augmentation_reference, cropsize=CROPSIZE))
    ref = jax.block_until_ready(ref_fn(x, top, left, flip_h, flip_v))

    # One-hot selection matmuls are not guaranteed bit-exact for f32 pixels on the
    # MXU (bf16 multi-pass decomposition); the tolerance covers that worst case.
    assert jnp.allclose(out, ref, rtol=1e-2, atol=1e-5), float(jnp.max(jnp.abs(out - ref)))
    print("KERNEL_OK")
</pallas_src>

<mosaic_0001>
module attributes {stable_mosaic.version = 11 : i64} {
  func.func @_augment_kernel(%arg0: i32, %arg1: memref<1xi32, #tpu.memory_space<smem>>, %arg2: memref<1x4x48x48xf32, #tpu.memory_space<vmem>>, %arg3: memref<32x32xf32, #tpu.memory_space<vmem>>, %arg4: memref<48x32xf32, #tpu.memory_space<vmem>>, %arg5: memref<1x4x32x32xf32, #tpu.memory_space<vmem>>) attributes {dimension_semantics = [#tpu.dimension_semantics<parallel>], iteration_bounds = array<i64: 2>, scalar_prefetch = 1 : i64, scratch_operands = 0 : i64, tpu.core_type = #tpu.core_type<tc>, window_params = [{transform_indices = @transform_0, window_bounds = array<i64: 1, 4, 48, 48>}, {pipeline_mode = #tpu.pipeline_mode<synchronous>, transform_indices = @transform_1, window_bounds = array<i64: 32, 32>}, {pipeline_mode = #tpu.pipeline_mode<synchronous>, transform_indices = @transform_2, window_bounds = array<i64: 48, 32>}, {transform_indices = @transform_3, window_bounds = array<i64: 1, 4, 32, 32>}]} {
    %c0 = arith.constant 0 : index
    %0 = memref.load %arg1[%c0] : memref<1xi32, #tpu.memory_space<smem>>
    %c0_0 = arith.constant 0 : index
    %c0_1 = arith.constant 0 : index
    %1 = arith.index_cast %0 : i32 to index
    %c0_2 = arith.constant 0 : index
    %2 = vector.load %arg2[%c0_0, %c0_1, %1, %c0_2] : memref<1x4x48x48xf32, #tpu.memory_space<vmem>>, vector<1x4x32x48xf32>
    %3 = vector.shape_cast %2 : vector<1x4x32x48xf32> to vector<4x32x48xf32>
    %c0_3 = arith.constant 0 : index
    %c0_4 = arith.constant 0 : index
    %4 = vector.load %arg3[%c0_3, %c0_4] : memref<32x32xf32, #tpu.memory_space<vmem>>, vector<32x32xf32>
    %5 = vector.shape_cast %4 : vector<32x32xf32> to vector<1x32x32xf32>
    %6 = vector.broadcast %5 : vector<1x32x32xf32> to vector<4x32x32xf32>
    "tpu.trace_start"() <{level = 10 : i32, message = "gij,gjw->giw"}> : () -> ()
    %cst = arith.constant dense<0.000000e+00> : vector<4x32x48xf32>
    %7 = tpu.matmul %6, %3, %cst {dimension_numbers = #tpu.dot_dimension_numbers<[2], [1], [1], [2], [0, 0, 0, 1, 1, 2], [0], [0]>} : vector<4x32x32xf32>, vector<4x32x48xf32>, vector<4x32x48xf32> -> vector<4x32x48xf32>
    "tpu.trace_stop"() : () -> ()
    %8 = vector.shape_cast %7 : vector<4x32x48xf32> to vector<128x48xf32>
    %c0_5 = arith.constant 0 : index
    %c0_6 = arith.constant 0 : index
    %9 = vector.load %arg4[%c0_5, %c0_6] : memref<48x32xf32, #tpu.memory_space<vmem>>, vector<48x32xf32>
    %cst_7 = arith.constant dense<0.000000e+00> : vector<128x32xf32>
    %10 = tpu.matmul %8, %9, %cst_7 {dimension_numbers = #tpu.dot_dimension_numbers<[1], [0], [0], [1], [0, 0, 1, 1], [], []>} : vector<128x48xf32>, vector<48x32xf32>, vector<128x32xf32> -> vector<128x32xf32>
    %11 = vector.shape_cast %10 : vector<128x32xf32> to vector<1x4x32x32xf32>
    %c0_8 = arith.constant 0 : index
    %c0_9 = arith.constant 0 : index
    %c0_10 = arith.constant 0 : index
    %c0_11 = arith.constant 0 : index
    %12 = vector.load %arg5[%c0_8, %c0_9, %c0_10, %c0_11] : memref<1x4x32x32xf32, #tpu.memory_space<vmem>>, vector<1x4x32x32xf32>
    tpu.vector_store %arg5[%c0_8, %c0_9, %c0_10, %c0_11], %11 {strides = array<i32>} : memref<1x4x32x32xf32, #tpu.memory_space<vmem>>, vector<1x4x32x32xf32>,
    return
  }
  func.func @transform_0(%arg0: i32, %arg1: memref<1xi32, #tpu.memory_space<smem>>) -> (i32, i32, i32, i32) {
    %c0_i32 = arith.constant 0 : i32
    %c0_i32_0 = arith.constant 0 : i32
    %c0_i32_1 = arith.constant 0 : i32
    %c0_i32_2 = arith.constant 0 : i32
    return %arg0, %c0_i32, %c0_i32_0, %c0_i32_1 : i32, i32, i32, i32
  }
  func.func @transform_1(%arg0: i32, %arg1: memref<1xi32, #tpu.memory_space<smem>>) -> (i32, i32) {
    %c0_i32 = arith.constant 0 : i32
    %c0_i32_0 = arith.constant 0 : i32
    %c0_i32_1 = arith.constant 0 : i32
    return %c0_i32, %c0_i32_0 : i32, i32
  }
  func.func @transform_2(%arg0: i32, %arg1: memref<1xi32, #tpu.memory_space<smem>>) -> (i32, i32) {
    %c0_i32 = arith.constant 0 : i32
    %c0_i32_0 = arith.constant 0 : i32
    %c0_i32_1 = arith.constant 0 : i32
    return %c0_i32, %c0_i32_0 : i32, i32
  }
  func.func @transform_3(%arg0: i32, %arg1: memref<1xi32, #tpu.memory_space<smem>>) -> (i32, i32, i32, i32) {
    %c0_i32 = arith.constant 0 : i32
    %c0_i32_0 = arith.constant 0 : i32
    %c0_i32_1 = arith.constant 0 : i32
    %c0_i32_2 = arith.constant 0 : i32
    return %arg0, %c0_i32, %c0_i32_0, %c0_i32_1 : i32, i32, i32, i32
  }
}

</mosaic_0001>

<bundles_post_ra>
// kernel: augmentation_forward.1
= control target key start
LH: loop header
LB: loop body
LE: loop exit
PB: predicated region body
PF: predicated region fallthrough
CT: control target
= control target key end

     0   :  { %s1517_s0 = inlined_call_operand.<no memory space> [shape: s32[1], index: 0, kind: input, shape index: {}]   ;;  %s1518_s1 = inlined_call_operand.hbm [shape: f32[2,4,48,48], index: 1, kind: input, shape index: {}]   ;;  %s1519_s2 = inlined_call_operand.vmem [shape: f32[32,32], index: 2, kind: input, shape index: {}]   ;;  %s1520_s3 = inlined_call_operand.vmem [shape: f32[48,32], index: 3, kind: input, shape index: {}]   ;;  %s1521_s4 = inlined_call_operand.hbm [shape: f32[2,4,32,32], index: 4, kind: output, shape index: {}]  }
   0x1   :  { %9 = sst [smem:[#allocation3]] %s1517_s0 }
   0x2   :  { %10 = vsyncpa [#allocation5], 0 }
   0x3   :  { %12 = vsyncpa [#allocation5 + $0x1], 0 }
   0x4   :  { %13 = vsyncpa [#allocation6], 0 }
   0x5   :  { %15 = vsyncpa [#allocation6 + $0x1], 0  ;;  %s1253_s17 = smov 0   ;;  %s1255_s18 = smov 0  }
   0x6   :  { %s1257_s19 = smov 0   ;;  %s1259_s20 = smov 0  }
   0x7 LB: > { %s1274_s0 = sadd.s32 4294967295, %s1217_s20   ;;  %s870_s21 = sadd.s32 4294967294, %s1217_s20   ;;  %s1217_s20 = sphi %s1259_s20, %s1535_s20   ;;  %s1213_s19 = sphi %s1257_s19, %s1534_s19   ;;  %s1209_s18 = sphi %s1255_s18, %s1533_s18   ;;  %s1205_s17 = sphi %s1253_s17, %s1532_s17  }
   0x8   : > { %s1278_s22 = sadd.s32 1, %s1217_s20   ;;  %s28_s23 = sadd.s32 1, %s1213_s19 }
   0x9   : > { %s25_s24 = ssub.s32 %s1217_s20, %s1278_s22  ;;  %p35_p0 = scmp.ne.s32.totalorder %s1213_s19, %s1209_s18 }
   0xa   : > { %p26_p1 = scmp.eq.s32.totalorder %s25_s24, 0  ;;  %p36_p2 = scmp.eq.s32.totalorder %s1217_s20, 0 }
   0xb   : > { %p41_p3 = scmp.ne.s32.totalorder %s1209_s18, %s1205_s17  ;;  %p42_p4 = scmp.eq.s32.totalorder %s1274_s0, 0 }
   0xc   : > { %s1290_s25 = scalar_select %p26_p1, %s1213_s19, %s28_s23  }
   0xd   : > { %p37_p5 = por %p36_p2, %p35_p0  ;;  %p1292_p6 = por %p42_p4, %p41_p3 }
   0xe   : > { %p107_p7 = scmp.eq.s32.totalorder %s1274_s0, 1  ;;  %p113_p8 = scmp.eq.s32.totalorder %s870_s21, 1 }
   0xf   : > { %s1524_s26 = scalar_select %p1292_p6, 1, 0 }
  0x10   : > { %p1087_p10 = scmp.lt.s32.totalorder %s1217_s20, 2  ;;  %p1299_p11 = por %p107_p7, %p35_p0 }
  0x11   : > { %p1303_p12 = por %p113_p8, %p41_p3  ;;  %s139_s29 = sand.u32 1, %s1213_s19  }
  0x12   : > { %s1525_s27 = scalar_select %p1299_p11, 1, 0 }
  0x13   : > { %s1526_s28 = scalar_select %p1303_p12, 1, 0 }
  0x14   : > { %s1073_s30 = smul.u32 3072, %s1217_s20  ;;  %p1314_p13 = pnand %p1087_p10, %p37_p5 }
  0x15   : > { %s1072_s5 = smul.u32 192, %s139_s29  ;;  %s1320_s12 = scalar_lea.sflag [#allocation5], %s139_s29 }
  0x16   : > { %s1312_s8 = scalar_lea.hbm %s1518_s1, %s1073_s30  ;;  %p1127_p1 = pneg %p1314_p13 }
  0x17   : > { %s143_s10 = scalar_lea.vmem [#allocation4], %s1072_s5  ;;  %s1125_s13 = scalar_lea.hbm %s1312_s8, 3072 }
  0x18   : > { %s150_s11 = sshll.u32 %s143_s10, 4  ;;  %p1126_p0 = scmp.ne.s32.totalorder %s1312_s8, %s1125_s13  ;;  %s1318_s11 = int_to_ptr.vmem [resolvable:$true] %s150_s11 }
  0x19   : > { %s1130_s16 = scalar_lea.hbm %s1518_s1, 6144  ;;  %p1131_p4 = scmp.lt.s32.totalorder %s1312_s8, %s1518_s1 }
  0x1a   : > { %p1128_p2 = pnand %p1127_p1, %p1126_p0  ;;  %p1132_p5 = scmp.lt.s32.totalorder %s1130_s16, %s1125_s13 }
  0x1c   : > { %p1129_p3 = pneg %p1128_p2  ;;  %p1133_p7 = por %p1132_p5, %p1131_p4 }
  0x1e   : > { %p1134_p8 = pnand %p1133_p7, %p1129_p3 }
  0x20   : > { %1137 = shalt.err (!%p1134_p8)
}
  0x21   : > { %s1138_s24 = scalar_lea.vmem %s1318_s11, 3072  ;;  %s1219_s29 = smov [#allocation4]  }
  0x22   : > { %p1139_p10 = scmp.ne.s32.totalorder %s1318_s11, %s1138_s24  ;;  %s1143_s30 = sshll.u32 %s1219_s29, 4  ;;  %s1144_s30 = int_to_ptr.vmem [resolvable:$false] %s1143_s30 }
  0x23   : > { %s1145_s5 = scalar_lea.vmem %s1144_s30, 6144  ;;  %p1146_p2 = scmp.lt.s32.totalorder %s1318_s11, %s1144_s30 }
  0x24   : > { %p1141_p9 = pnand %p1139_p10, %p1127_p1  ;;  %p1147_p12 = scmp.lt.s32.totalorder %s1145_s5, %s1138_s24 }
  0x26   : > { %p1142_p0 = pneg %p1141_p9  ;;  %p1148_p11 = por %p1147_p12, %p1146_p2 }
  0x28   : > { %p1149_p6 = pnand %p1148_p11, %p1142_p0 }
  0x2a   : > { %1152 = shalt.err (!%p1149_p6)
}
  0x2b   : > { %s1220_s6 = smov 128   ;;  %s1221_s7 = smov 8  }
  0x2c   : > { %1082 = dma.hbm_to_vmem [thread:$0]  (!%p1314_p13), %s1312_s8, 3072, %s1318_s11, %s1320_s12, %s1220_s6, %s1220_s6, %s1221_s7  }
  0x2d   : > { %p874_p9 = scmp.ge.s32.totalorder %s1217_s20, 1  ;;  %p158_p1 = scmp.lt.s32.totalorder %s1217_s20, 3 }
  0x2f   : > { %p159_p3 = pnand %p874_p9, %p158_p1 }
  0x30   : > { %s1344_s10 = sand.u32 (!%p159_p3), 1, %s1209_s18   ;;  %p1528_p6 = scmp.ne.s32.totalorder (!%p159_p3), %s1524_s26, 0 }
  0x31   : > { %162 = sbr.rel (%p159_p3) target bundleno = 496 (0x1f0), region = 32  ;;  %s165_s14 = scalar_lea.sflag (!%p159_p3), [#allocation5], %s1344_s10 }
  0x32   : > { %s1074_s13 = smul.u32 (!%p159_p3), 192, %s1344_s10 }
  0x34   : > { %s168_s15 = scalar_lea.vmem (!%p159_p3), [#allocation4], %s1074_s13 }
  0x36   : > { %1196 = dma.done.wait (%p1528_p6), %s165_s14, 3072  }
  0x37   : > { %1198 = vsyncadd (%p1528_p6), %s165_s14, 4294964224  ;;  %s191_s9 = sld [smem:[#allocation3]]  ;;  %vm213_vm0 = vcmask 261120   ;;  %v209_v0 = vld [vmem:[%s1519_s2] sm:$0xff]  ;;  %v210_v9 = vld [vmem:[%s1519_s2 + $0x8] sm:$0xff]  ;;  %vm572_vm1 = vcmask 392192  }
  0x38   : > { %976 = vmatprep.mubr.msk.f32.mxu0 %vm213_vm0, %v209_v0  ;;  %990 = vmatprep.mubr.msk.f32.mxu1 %vm213_vm0, %v209_v0  ;;  %v211_v11 = vld [vmem:[%s1519_s2 + $0x10] sm:$0xff]  ;;  %v212_v13 = vld [vmem:[%s1519_s2 + $0x18] sm:$0xff]  ;;  %v571_v20 = vld [vmem:[%s1520_s3 + $0x28] sm:$0xff]  ;;  %s875_s16 = sshll.u32 %s1344_s10, 7  ;;  %s913_s23 = sshll.u32 %s1274_s0, 11 }
  0x39   : > { %v570_v21 = vld [vmem:[%s1520_s3 + $0x20] sm:$0xff]  ;;  %v569_v22 = vld [vmem:[%s1520_s3 + $0x18] sm:$0xff]  ;;  %v568_v23 = vld [vmem:[%s1520_s3 + $0x10] sm:$0xff]  ;;  %s1433_s21 = scalar_lea.vmem [#allocation7], %s875_s16  ;;  %s1468_s5 = scalar_lea.hbm %s1521_s4, %s913_s23 }
  0x3a   : > { %v567_v24 = vld [vmem:[%s1520_s3 + $0x8] sm:$0xff]  ;;  %v566_v25 = vld [vmem:[%s1520_s3] sm:$0xff]  ;;  %s796_s24 = sshll.u32 %s1433_s21, 4  ;;  %s783_s0 = scalar_lea.sflag [#allocation6], %s1344_s10  ;;  %s1470_s24 = int_to_ptr.vmem [resolvable:$true] %s796_s24 }
  0x3b   : > { %s1153_s6 = scalar_lea.vmem %s1470_s24, 2048  ;;  %p1529_p12 = scmp.ne.s32.totalorder %s1525_s27, 0 }
  0x3c   : > { %p1154_p11 = scmp.ne.s32.totalorder %s1470_s24, %s1153_s6  ;;  %s1222_s7 = smov [#allocation7]  }
  0x3d   : > { %s1352_s8 = scalar_lea.vmem %s168_s15, %s191_s9 [#allocation4]  ;;  %s1157_s13 = sshll.u32 %s1222_s7, 4  ;;  %s1158_s13 = int_to_ptr.vmem [resolvable:$false] %s1157_s13 }
  0x3e   : > { %v196_v1 = vld [vmem:[%s1352_s8 + $0x18] sm:$0xff]  ;;  %v195_v2 = vld [vmem:[%s1352_s8 + $0x10] sm:$0xff]  ;;  %v200_v3 = vld [vmem:[%s1352_s8 + $0x48] sm:$0xff]  ;;  %p1155_p13 = pnand %p1154_p11, %p1529_p12  ;;  %s1159_s14 = scalar_lea.vmem %s1158_s13, 4096 }
  0x3f   : > { %968 = vmatprep.subr.mxu0 %v196_v1  ;;  %v194_v4 = vld [vmem:[%s1352_s8 + $0x8] sm:$0xff]  ;;  %982 = vmatprep.subr.mxu1 %v200_v3  ;;  %v199_v5 = vld [vmem:[%s1352_s8 + $0x40] sm:$0xff]  ;;  %v198_v6 = vld [vmem:[%s1352_s8 + $0x38] sm:$0xff]  ;;  %p1160_p5 = scmp.lt.s32.totalorder %s1470_s24, %s1158_s13  ;;  %p1161_p7 = scmp.lt.s32.totalorder %s1159_s14, %s1153_s6 }
  0x40   : > { %969 = vmatpush3.msra.mxu0 %v196_v1  ;;  %983 = vmatpush3.msra.mxu1 %v200_v3  ;;  %v193_v7 = vld [vmem:[%s1352_s8] sm:$0xff]  ;;  %v197_v8 = vld [vmem:[%s1352_s8 + $0x30] sm:$0xff]  ;;  %v204_v10 = vld [vmem:[%s1352_s8 + $0x78] sm:$0xff]  ;;  %p1156_p4 = pneg %p1155_p13 }
  0x41   : > { %970 = vmatprep.subr.mxu0 %v195_v2  ;;  %984 = vmatprep.subr.mxu1 %v199_v5  ;;  %v203_v12 = vld [vmem:[%s1352_s8 + $0x70] sm:$0xff]  ;;  %v202_v14 = vld [vmem:[%s1352_s8 + $0x68] sm:$0xff]  ;;  %v201_v15 = vld [vmem:[%s1352_s8 + $0x60] sm:$0xff]  ;;  %p1162_p8 = por %p1161_p7, %p1160_p5 }
  0x42   : > { %971 = vmatpush3.msra.mxu0 %v195_v2  ;;  %985 = vmatpush3.msra.mxu1 %v199_v5  ;;  %v208_v16 = vld [vmem:[%s1352_s8 + $0xa8] sm:$0xff]  ;;  %v207_v17 = vld [vmem:[%s1352_s8 + $0xa0] sm:$0xff]  ;;  %v206_v18 = vld [vmem:[%s1352_s8 + $0x98] sm:$0xff] }
  0x43   : > { %972 = vmatprep.subr.mxu0 %v194_v4  ;;  %986 = vmatprep.subr.mxu1 %v198_v6  ;;  %v205_v19 = vld [vmem:[%s1352_s8 + $0x90] sm:$0xff]  ;;  %p1163_p10 = pnand %p1162_p8, %p1156_p4 }
  0x44   : > { %973 = vmatpush3.msra.mxu0 %v194_v4  ;;  %987 = vmatpush3.msra.mxu1 %v198_v6 }
  0x45   : > { %974 = vmatprep.subr.mxu0 %v193_v7  ;;  %988 = vmatprep.subr.mxu1 %v197_v8 }
  0x46   : > { %975 = vmatpush3.msra.mxu0 %v193_v7  ;;  %989 = vmatpush3.msra.mxu1 %v197_v8 }
  0x47   : > { %977 = vmatmul.mubr.msk.f32.vlgmr.msra.gmra.mxu0 %vm213_vm0, %v210_v9  ;;  %996 = vmatprep.subr.mxu0 %v204_v10 }
  0x48   : > { %997 = vmatpush3.msra.mxu0 %v204_v10  ;;  %979 = vmatprep.mubr.msk.f32.mxu0 %vm213_vm0, %v211_v11 }
  0x49   : > { %998 = vmatprep.subr.mxu0 %v203_v12  ;;  %991 = vmatmul.mubr.msk.f32.vlgmr.msra.gmra.mxu1 %vm213_vm0, %v210_v9 }
  0x4a   : > { %999 = vmatpush3.msra.mxu0 %v203_v12  ;;  %1010 = vmatprep.subr.mxu1 %v208_v16 }
  0x4b   : > { %980 = vmatmul.mubr.msk.f32.gmra.mxu0 %vm213_vm0, %v212_v13  ;;  %1000 = vmatprep.subr.mxu0 %v202_v14 }
  0x4c   : > { %1001 = vmatpush3.msra.mxu0 %v202_v14  ;;  %1004 = vmatprep.mubr.msk.f32.mxu0 %vm213_vm0, %v209_v0 }
  0x4d   : > { %1002 = vmatprep.subr.mxu0 %v201_v15  ;;  %1011 = vmatpush3.msra.mxu1 %v208_v16 }
  0x4e   : > { %1003 = vmatpush3.msra.mxu0 %v201_v15  ;;  %1012 = vmatprep.subr.mxu1 %v207_v17 }
  0x4f   : > { %1005 = vmatmul.mubr.msk.f32.vlgmr.msra.gmra.mxu0 %vm213_vm0, %v210_v9  ;;  %993 = vmatprep.mubr.msk.f32.mxu1 %vm213_vm0, %v211_v11 }
  0x50   : > { %1013 = vmatpush3.msra.mxu1 %v207_v17  ;;  %1007 = vmatprep.mubr.msk.f32.mxu0 %vm213_vm0, %v211_v11 }
  0x51   : > { %994 = vmatmul.mubr.msk.f32.gmra.mxu1 %vm213_vm0, %v212_v13  ;;  %1014 = vmatprep.subr.mxu1 %v206_v18 }
  0x52   : > { %1018 = vmatprep.mubr.msk.f32.mxu1 %vm213_vm0, %v209_v0  ;;  %1015 = vmatpush3.msra.mxu1 %v206_v18 }
  0x53   : > { %1008 = vmatmul.mubr.msk.f32.gmra.mxu0 %vm213_vm0, %v212_v13  ;;  %1016 = vmatprep.subr.mxu1 %v205_v19 }
  0x54   : > { %1024 = vmatprep.subr.mxu0 %v571_v20  ;;  %1017 = vmatpush3.msra.mxu1 %v205_v19 }
  0x55   : > { %1025 = vmatpush3.msra.mxu0 %v571_v20  ;;  %1019 = vmatmul.mubr.msk.f32.vlgmr.msra.gmra.mxu1 %vm213_vm0, %v210_v9 }
  0x56   : > { %1026 = vmatprep.subr.mxu0 %v570_v21  ;;  %1021 = vmatprep.mubr.msk.f32.mxu1 %vm213_vm0, %v211_v11 }
  0x57   : > { %1027 = vmatpush3.msra.mxu0 %v570_v21  ;;  %1060 = vmatprep.subr.mxu1 %v571_v20 }
  0x58   : > { %1028 = vmatprep.subr.mxu0 %v569_v22  ;;  %1066 = vmatpush3.msra.mxu1 %v571_v20 }
  0x59   : > { %1029 = vmatpush3.msra.mxu0 %v569_v22  ;;  %1022 = vmatmul.mubr.msk.f32.gmra.mxu1 %vm213_vm0, %v212_v13 }
  0x5a   : > { %1030 = vmatprep.subr.mxu0 %v568_v23  ;;  %1061 = vmatprep.subr.mxu1 %v570_v21 }
  0x5b   : > { %1031 = vmatpush3.msra.mxu0 %v568_v23  ;;  %1067 = vmatpush3.msra.mxu1 %v570_v21 }
  0x5c   : > { %1062 = vmatprep.subr.mxu1 %v569_v22  ;;  %1032 = vmatprep.subr.mxu0 %v567_v24 }
  0x5d   : > { %1068 = vmatpush3.msra.mxu1 %v569_v22  ;;  %1033 = vmatpush3.msra.mxu0 %v567_v24 }
  0x5e   : > { %1063 = vmatprep.subr.mxu1 %v568_v23  ;;  %1034 = vmatprep.subr.mxu0 %v566_v25 }
  0x5f   : > { %1069 = vmatpush3.msra.mxu1 %v568_v23  ;;  %1035 = vmatpush3.msra.mxu0 %v566_v25 }
  0x60   : > { %1064 = vmatprep.subr.mxu1 %v567_v24 }
  0x61   : > { %1070 = vmatpush3.msra.mxu1 %v567_v24 }
  0x62   : > { %1065 = vmatprep.subr.mxu1 %v566_v25 }
  0x63   : > { %1071 = vmatpush3.msra.mxu1 %v566_v25 }
 0x107   : > { %v978_v26 = vpop.f32.mrf.mxu0 }
 0x109   : > { %v292_v27 = vpop.f32.mrf.mxu0  ;;  %v992_v28 = vpop.f32.mrf.mxu1 }
 0x10a   : > { %1036 = vmatprep.mubr.msk.f32.mxu0 %vm572_vm1, %v292_v27 }
 0x10b   : > { %v981_v29 = vpop.f32.mrf.mxu0  ;;  %1037 = vmatmul.mubr.msk.f32.vlgmr.msra.gmra.mxu0 %vm572_vm1, %v978_v26  ;;  %v377_v31 = vpop.f32.mrf.mxu1 }
 0x10d   : > { %v302_v30 = vpop.f32.mrf.mxu0 }
 0x10e   : > { %1039 = vmatprep.mubr.msk.f32.mxu0 %vm572_vm1, %v302_v30 }
 0x10f   : > { %v1006_v32 = vpop.f32.mrf.mxu0  ;;  %1040 = vmatmul.mubr.msk.f32.gmra.mxu0 %vm572_vm1, %v981_v29 }
 0x110   : > { %1042 = vmatprep.mubr.msk.f32.mxu0 %vm572_vm1, %v377_v31 }
 0x111   : > { %v462_v33 = vpop.f32.mrf.mxu0  ;;  %v995_v34 = vpop.f32.mrf.mxu1 }
 0x112   : > { %1048 = vmatprep.mubr.msk.f32.mxu1 %vm572_vm1, %v462_v33 }
 0x113   : > { %v1009_v35 = vpop.f32.mrf.mxu0  ;;  %1043 = vmatmul.mubr.msk.f32.gmra.mxu0 %vm572_vm1, %v992_v28  ;;  %1049 = vmatmul.mubr.msk.f32.vlgmr.msra.gmra.mxu1 %vm572_vm1, %v1006_v32  ;;  %v387_v36 = vpop.f32.mrf.mxu1 }
 0x114   : > { %1045 = vmatprep.mubr.msk.f32.mxu0 %vm572_vm1, %v387_v36 }
 0x115   : > { %v472_v37 = vpop.f32.mrf.mxu0  ;;  %v1020_v38 = vpop.f32.mrf.mxu1 }
 0x116   : > { %1051 = vmatprep.mubr.msk.f32.mxu1 %vm572_vm1, %v472_v37 }
 0x117   : > { %1046 = vmatmul.mubr.msk.f32.gmra.mxu0 %vm572_vm1, %v995_v34  ;;  %1052 = vmatmul.mubr.msk.f32.gmra.mxu1 %vm572_vm1, %v1009_v35  ;;  %v547_v39 = vpop.f32.mrf.mxu1 }
 0x118   : > { %1054 = vmatprep.mubr.msk.f32.mxu1 %vm572_vm1, %v547_v39 }
 0x119   : > { %v1023_v40 = vpop.f32.mrf.mxu1 }
 0x11b   : > { %1055 = vmatmul.mubr.msk.f32.gmra.mxu1 %vm572_vm1, %v1020_v38  ;;  %v557_v41 = vpop.f32.mrf.mxu1 }
 0x11c   : > { %1057 = vmatprep.mubr.msk.f32.mxu1 %vm572_vm1, %v557_v41 }
 0x11f   : > { %1058 = vmatmul.mubr.msk.f32.gmra.mxu1 %vm572_vm1, %v1023_v40 }
 0x1cb   : > { %v1038_v42 = vpop.f32.mrf.mxu0 }
 0x1cc   : > { %767 = vst.msk [vmem:[%s1433_s21 + $0x8] sm:$0xff] %vm213_vm0, %v1038_v42 }
 0x1cd   : > { %v687_v43 = vpop.f32.mrf.mxu0 }
 0x1ce   : > { %766 = vst.msk [vmem:[%s1433_s21] sm:$0xff] %vm213_vm0, %v687_v43 }
 0x1cf   : > { %v1041_v44 = vpop.f32.mrf.mxu0 }
 0x1d0   : > { %769 = vst.msk [vmem:[%s1433_s21 + $0x18] sm:$0xff] %vm213_vm0, %v1041_v44 }
 0x1d1   : > { %v697_v45 = vpop.f32.mrf.mxu0 }
 0x1d2   : > { %768 = vst.msk [vmem:[%s1433_s21 + $0x10] sm:$0xff] %vm213_vm0, %v697_v45 }
 0x1d3   : > { %v1044_v46 = vpop.f32.mrf.mxu0  ;;  %v1050_v47 = vpop.f32.mrf.mxu1 }
 0x1d4   : > { %771 = vst.msk [vmem:[%s1433_s21 + $0x28] sm:$0xff] %vm213_vm0, %v1044_v46  ;;  %775 = vst.msk [vmem:[%s1433_s21 + $0x48] sm:$0xff] %vm213_vm0, %v1050_v47 }
 0x1d5   : > { %v707_v48 = vpop.f32.mrf.mxu0  ;;  %v727_v49 = vpop.f32.mrf.mxu1 }
 0x1d6   : > { %770 = vst.msk [vmem:[%s1433_s21 + $0x20] sm:$0xff] %vm213_vm0, %v707_v48  ;;  %774 = vst.msk [vmem:[%s1433_s21 + $0x40] sm:$0xff] %vm213_vm0, %v727_v49 }
 0x1d7   : > { %v1047_v50 = vpop.f32.mrf.mxu0  ;;  %v1053_v51 = vpop.f32.mrf.mxu1 }
 0x1d8   : > { %773 = vst.msk [vmem:[%s1433_s21 + $0x38] sm:$0xff] %vm213_vm0, %v1047_v50  ;;  %777 = vst.msk [vmem:[%s1433_s21 + $0x58] sm:$0xff] %vm213_vm0, %v1053_v51 }
 0x1d9   : > { %v717_v52 = vpop.f32.mrf.mxu0  ;;  %v737_v53 = vpop.f32.mrf.mxu1 }
 0x1da   : > { %772 = vst.msk [vmem:[%s1433_s21 + $0x30] sm:$0xff] %vm213_vm0, %v717_v52  ;;  %776 = vst.msk [vmem:[%s1433_s21 + $0x50] sm:$0xff] %vm213_vm0, %v737_v53 }
 0x1db   : > { %v1056_v54 = vpop.f32.mrf.mxu1 }
 0x1dc   : > { %779 = vst.msk [vmem:[%s1433_s21 + $0x68] sm:$0xff] %vm213_vm0, %v1056_v54 }
 0x1dd   : > { %v747_v55 = vpop.f32.mrf.mxu1 }
 0x1de   : > { %778 = vst.msk [vmem:[%s1433_s21 + $0x60] sm:$0xff] %vm213_vm0, %v747_v55 }
 0x1df   : > { %v1059_v56 = vpop.f32.mrf.mxu1 }
 0x1e0   : > { %781 = vst.msk [vmem:[%s1433_s21 + $0x78] sm:$0xff] %vm213_vm0, %v1059_v56 }
 0x1e1   : > { %v757_v57 = vpop.f32.mrf.mxu1 }
 0x1e2   : > { %780 = vst.msk [vmem:[%s1433_s21 + $0x70] sm:$0xff] %vm213_vm0, %v757_v57 }
 0x1e3   : > { %1166 = shalt.err (!%p1163_p10)
}
 0x1e4   : > { %s1167_s15 = scalar_lea.hbm %s1468_s5, 2048  ;;  %s1171_s11 = scalar_lea.hbm %s1521_s4, 4096 }
 0x1e5   : > { %p1168_p0 = scmp.ne.s32.totalorder %s1468_s5, %s1167_s15  ;;  %p1172_p1 = scmp.lt.s32.totalorder %s1468_s5, %s1521_s4 }
 0x1e6   : > { %p1173_p3 = scmp.lt.s32.totalorder %s1171_s11, %s1167_s15 }
 0x1e7   : > { %p1169_p2 = pnand %p1168_p0, %p1529_p12 }
 0x1e8   : > { %p1174_p6 = por %p1173_p3, %p1172_p1 }
 0x1e9   : > { %p1170_p9 = pneg %p1169_p2 }
 0x1eb   : > { %p1175_p11 = pnand %p1174_p6, %p1170_p9 }
 0x1ed   : > { %1178 = shalt.err (!%p1175_p11)
}
 0x1ee   : > { %s1223_s16 = smov 128   ;;  %s1224_s21 = smov 8  }
 0x1ef   : > { %1077 = dma.vmem_to_hbm [thread:$0]  (%p1529_p12), %s1470_s24, 2048, %s1468_s5, %s783_s0, %s1223_s16, %s1223_s16, %s1224_s21  }
 0x1f0 PF: > { %s811_s23 = sand.u32 1, %s1205_s17   ;;  %p1530_p13 = scmp.ne.s32.totalorder %s1526_s28, 0 }
 0x1f1   : > { %p1531_p4 = scmp.ge.s32.totalorder %s1217_s20, 2  ;;  %s812_s29 = scalar_lea.sflag [#allocation6], %s811_s23 }
 0x1f3   : > { %p1084_p5 = pnand %p1531_p4, %p1530_p13 }
 0x1f5   : > { %p1085_p7 = pneg %p1084_p5 }
 0x1f7   : > { %1200 = dma.done.wait (%p1085_p7), %s812_s29, 2048  }
 0x1f8   : > { %1202 = vsyncadd (%p1085_p7), %s812_s29, 4294965248  ;;  %p18_p8 = scmp.ge.s32.totalorder %s1278_s22, 4   ;;  %s1532_s17 = smov %s1209_s18 }
 0x1f9   : > { %s1533_s18 = smov %s1213_s19  ;;  %s1534_s19 = smov %s1290_s25 }
 0x1fa   : > { %s1535_s20 = smov %s1278_s22  ;;  %20 = sbr.rel (!%p18_p8) target bundleno = 7 (0x7), region = 78 }
 0x1ff   :  { %817 = vsyncpa [#allocation5], 1 }
 0x200   :  { %819 = vsyncpa [#allocation5 + $0x1], 1 }
 0x201   :  { %820 = vsyncpa [#allocation6], 1 }
 0x202   :  { %822 = vsyncpa [#allocation6 + $0x1], 1 }

</bundles_post_ra>
